<compile_context>
chip_gen: v6e
topology: v6e:2x2x1
jax: 0.10.0
libtpu: 0.0.40
codegen_flags: <defaults>
</compile_context>

<pallas_src>
import functools

import jax
import jax.numpy as jnp
from jax.experimental import pallas as pl
from jax.experimental.pallas import tpu as pltpu


def _round_up(x, m):
    return (x + m - 1) // m * m


def sae_kernel(x_ref, we_ref, be_ref, wd_ref, feat_ref, rec_ref, acc_ref):
    """One (batch-tile i, hidden-tile h) grid step.

    x_ref:    (tm, D)       input tile (compute dtype, e.g. bf16)
    we_ref:   (D, th)       W_enc.T tile
    be_ref:   (1, th)       encoder bias tile (f32)
    wd_ref:   (th, D)       W_dec.T tile
    feat_ref: (tm, th)      features output tile
    rec_ref:  (tm, D)       reconstruction output tile (resident across h axis)
    acc_ref:  (tm, D) f32   VMEM accumulator for the decoder reduction over H
    """
    h = pl.program_id(1)

    @pl.when(h == 0)
    def _():
        acc_ref[...] = jnp.zeros_like(acc_ref)

    # Encoder: the full D reduction happens in this single step, so bias + ReLU
    # here produce the final feature values for this hidden tile.
    pre = jnp.dot(x_ref[...], we_ref[...],
                  preferred_element_type=jnp.float32) + be_ref[...]
    feat = jnp.maximum(pre, 0.0)                       # f32
    feat_ref[...] = feat.astype(feat_ref.dtype)

    # Decoder: accumulate this hidden tile's contribution to the reconstruction.
    acc_ref[...] += jnp.dot(feat.astype(wd_ref.dtype), wd_ref[...],
                            preferred_element_type=jnp.float32)

    @pl.when(h == pl.num_programs(1) - 1)
    def _():
        rec_ref[...] = acc_ref[...].astype(rec_ref.dtype)


def prepare_sae_params(enc_weight, enc_bias, dec_weight,
                       compute_dtype=jnp.bfloat16):
    """Transpose / cast torch-layout params ONCE (outside the per-step forward).

    enc_weight: (H, D)  torch nn.Linear(input_dim, hidden_dim).weight
    enc_bias:   (H,)
    dec_weight: (D, H)  torch nn.Linear(hidden_dim, input_dim, bias=False).weight
    Returns (W_enc.T (D,H), bias (1,H) f32, W_dec.T (H,D)).
    """
    we_t = jnp.asarray(enc_weight, dtype=compute_dtype).T    # (D, H)
    be = jnp.asarray(enc_bias, dtype=jnp.float32).reshape(1, -1)
    wd_t = jnp.asarray(dec_weight, dtype=compute_dtype).T    # (H, D)
    return we_t, be, wd_t


@functools.partial(jax.jit, static_argnames=("tm", "th"))
def sparse_autoencoder_forward(x, we_t, be, wd_t, *, tm=128, th=512):
    """Forward pass. x: (B, D). Returns (features (B, H), reconstruction (B, D))."""
    B, D = x.shape
    H = we_t.shape[1]
    out_dtype = x.dtype
    compute_dtype = we_t.dtype

    # ---- tile selection ----
    sub = 16 if compute_dtype == jnp.bfloat16 else 8   # sublane packing
    tm_eff = min(tm, _round_up(B, sub))
    tm_eff = _round_up(tm_eff, sub)
    B_pad = _round_up(B, tm_eff)

    if H <= th:
        th_eff = H
    else:
        th_eff = th
        while th_eff > 0 and H % th_eff != 0:
            th_eff -= 128
        if th_eff <= 0:
            th_eff = H   # fall back to a resident hidden dim

    x_c = x.astype(compute_dtype)
    if B_pad != B:
        x_c = jnp.pad(x_c, ((0, B_pad - B), (0, 0)))

    grid = (B_pad // tm_eff, H // th_eff)

    itemsize_out = jnp.dtype(out_dtype).itemsize
    flops = 4 * B_pad * D * H   # two matmuls of 2*B*D*H each
    bytes_accessed = (
        x_c.size * x_c.dtype.itemsize
        + we_t.size * we_t.dtype.itemsize
        + be.size * be.dtype.itemsize
        + wd_t.size * wd_t.dtype.itemsize
        + B_pad * H * itemsize_out
        + B_pad * D * itemsize_out)

    feats, rec = pl.pallas_call(
        sae_kernel,
        out_shape=(
            jax.ShapeDtypeStruct((B_pad, H), out_dtype),
            jax.ShapeDtypeStruct((B_pad, D), out_dtype),
        ),
        grid_spec=pltpu.PrefetchScalarGridSpec(
            num_scalar_prefetch=0,
            grid=grid,
            in_specs=[
                pl.BlockSpec((tm_eff, D), lambda i, h: (i, 0)),    # x tile
                pl.BlockSpec((D, th_eff), lambda i, h: (0, h)),    # W_enc.T tile
                pl.BlockSpec((1, th_eff), lambda i, h: (0, h)),    # bias tile
                pl.BlockSpec((th_eff, D), lambda i, h: (h, 0)),    # W_dec.T tile
            ],
            out_specs=[
                pl.BlockSpec((tm_eff, th_eff), lambda i, h: (i, h)),  # features
                pl.BlockSpec((tm_eff, D), lambda i, h: (i, 0)),       # reconstruction
            ],
            scratch_shapes=[pltpu.VMEM((tm_eff, D), jnp.float32)],
        ),
        compiler_params=pltpu.CompilerParams(
            dimension_semantics=("parallel", "arbitrary"),
            vmem_limit_bytes=64 * 1024 * 1024,
        ),
        cost_estimate=pl.CostEstimate(
            flops=flops, transcendentals=0, bytes_accessed=bytes_accessed),
    )(x_c, we_t, be, wd_t)

    if B_pad != B:
        feats = feats[:B]
        rec = rec[:B]
    return feats, rec


def init_sae_params(key, input_dim, hidden_dim, dtype=jnp.float32):
    """Matches SparseAutoencoder.initialize_weights():
       decoder.weight ~ N(0, 0.0001), encoder.weight = decoder.weight.T, bias = 0.
    Returned in torch nn.Linear layouts."""
    dec_weight = (jax.random.normal(key, (input_dim, hidden_dim),
                                    dtype=jnp.float32) * 1e-4).astype(dtype)
    enc_weight = dec_weight.T                       # (hidden_dim, input_dim)
    enc_bias = jnp.zeros((hidden_dim,), dtype=dtype)
    return enc_weight, enc_bias, dec_weight
    # TODO(synk): the torch module's NaN/Inf check_tensor debug prints are host-side
    # logging and are intentionally not replicated inside the kernel.


if __name__ == "__main__":
    key = jax.random.PRNGKey(0)
    k_x, k_w = jax.random.split(key)

    # Small demo shapes; ragged batch (30) exercises the padding path, and
    # th=256 with hidden_dim=512 exercises the H-tiled accumulator (2 h-steps).
    batch, input_dim, hidden_dim = 30, 256, 512

    x = jax.random.normal(k_x, (batch, input_dim), dtype=jnp.float32)
    enc_w, enc_b, dec_w = init_sae_params(k_w, input_dim, hidden_dim)

    # ---- f32 path: exact semantics check vs. pure-JAX reference ----
    we_t, be, wd_t = prepare_sae_params(enc_w, enc_b, dec_w,
                                        compute_dtype=jnp.float32)
    feats, rec = sparse_autoencoder_forward(x, we_t, be, wd_t, tm=16, th=256)
    feats = jax.block_until_ready(feats)
    rec = jax.block_until_ready(rec)

    feats_ref = jnp.maximum(x @ enc_w.T + enc_b, 0.0)
    rec_ref = feats_ref @ dec_w.T
    assert feats.shape == (batch, hidden_dim) and rec.shape == (batch, input_dim)
    assert jnp.allclose(feats, feats_ref, atol=1e-5, rtol=1e-5)
    assert jnp.allclose(rec, rec_ref, atol=1e-5, rtol=1e-5)

    # ---- bf16-weight path (MXU-native): check vs. matching mixed-precision ref ----
    we_tb, beb, wd_tb = prepare_sae_params(enc_w, enc_b, dec_w,
                                           compute_dtype=jnp.bfloat16)
    feats_b, rec_b = sparse_autoencoder_forward(x, we_tb, beb, wd_tb, tm=16, th=256)
    feats_b = jax.block_until_ready(feats_b)
    rec_b = jax.block_until_ready(rec_b)

    x_b = x.astype(jnp.bfloat16)
    feats_mp = jnp.maximum(
        jnp.dot(x_b, we_tb, preferred_element_type=jnp.float32) + beb, 0.0)
    rec_mp = jnp.dot(feats_mp.astype(jnp.bfloat16), wd_tb,
                     preferred_element_type=jnp.float32)
    assert jnp.allclose(feats_b, feats_mp, atol=1e-4, rtol=5e-2)
    assert jnp.allclose(rec_b, rec_mp, atol=1e-4, rtol=5e-2)

    print("KERNEL_OK")
</pallas_src>

<mosaic_0001>
module attributes {stable_mosaic.version = 11 : i64} {
  func.func @sae_kernel(%arg0: i32, %arg1: i32, %arg2: memref<16x256xf32, #tpu.memory_space<vmem>>, %arg3: memref<256x256xf32, #tpu.memory_space<vmem>>, %arg4: memref<1x256xf32, #tpu.memory_space<vmem>>, %arg5: memref<256x256xf32, #tpu.memory_space<vmem>>, %arg6: memref<16x256xf32, #tpu.memory_space<vmem>>, %arg7: memref<16x256xf32, #tpu.memory_space<vmem>>, %arg8: memref<16x256xf32, #tpu.memory_space<vmem>>) attributes {dimension_semantics = [#tpu.dimension_semantics<parallel>, #tpu.dimension_semantics<arbitrary>], iteration_bounds = array<i64: 2, 2>, scalar_prefetch = 0 : i64, scratch_operands = 1 : i64, tpu.core_type = #tpu.core_type<tc>, window_params = [{transform_indices = @transform_0, window_bounds = array<i64: 16, 256>}, {transform_indices = @transform_1, window_bounds = array<i64: 256, 256>}, {transform_indices = @transform_2, window_bounds = array<i64: 1, 256>}, {transform_indices = @transform_3, window_bounds = array<i64: 256, 256>}, {transform_indices = @transform_4, window_bounds = array<i64: 16, 256>}, {transform_indices = @transform_5, window_bounds = array<i64: 16, 256>}]} {
    %c0_i32 = arith.constant 0 : i32
    %0 = arith.cmpi eq, %arg1, %c0_i32 : i32
    %1 = arith.extui %0 : i1 to i32
    %c0_i32_0 = arith.constant 0 : i32
    %2 = arith.cmpi ne, %1, %c0_i32_0 : i32
    scf.if %2 {
      %cst_17 = arith.constant 0.000000e+00 : f32
      %20 = vector.broadcast %cst_17 : f32 to vector<16x256xf32>
      %c0_18 = arith.constant 0 : index
      %c0_19 = arith.constant 0 : index
      %21 = vector.load %arg8[%c0_18, %c0_19] : memref<16x256xf32, #tpu.memory_space<vmem>>, vector<16x256xf32>
      tpu.vector_store %arg8[%c0_18, %c0_19], %20 {strides = array<i32>} : memref<16x256xf32, #tpu.memory_space<vmem>>, vector<16x256xf32>,
    } else {
    }
    %c0 = arith.constant 0 : index
    %c0_1 = arith.constant 0 : index
    %3 = vector.load %arg2[%c0, %c0_1] : memref<16x256xf32, #tpu.memory_space<vmem>>, vector<16x256xf32>
    %c0_2 = arith.constant 0 : index
    %c0_3 = arith.constant 0 : index
    %4 = vector.load %arg3[%c0_2, %c0_3] : memref<256x256xf32, #tpu.memory_space<vmem>>, vector<256x256xf32>
    %cst = arith.constant dense<0.000000e+00> : vector<16x256xf32>
    %5 = tpu.matmul %3, %4, %cst {dimension_numbers = #tpu.dot_dimension_numbers<[1], [0], [0], [1], [0, 0, 1, 1], [], []>} : vector<16x256xf32>, vector<256x256xf32>, vector<16x256xf32> -> vector<16x256xf32>
    %c0_4 = arith.constant 0 : index
    %c0_5 = arith.constant 0 : index
    %6 = vector.load %arg4[%c0_4, %c0_5] : memref<1x256xf32, #tpu.memory_space<vmem>>, vector<1x256xf32>
    %7 = vector.broadcast %6 : vector<1x256xf32> to vector<16x256xf32>
    %8 = arith.addf %5, %7 : vector<16x256xf32>
    %cst_6 = arith.constant 0.000000e+00 : f32
    %9 = vector.broadcast %cst_6 : f32 to vector<16x256xf32>
    %10 = arith.maximumf %8, %9 : vector<16x256xf32>
    %c0_7 = arith.constant 0 : index
    %c0_8 = arith.constant 0 : index
    %11 = vector.load %arg6[%c0_7, %c0_8] : memref<16x256xf32, #tpu.memory_space<vmem>>, vector<16x256xf32>
    tpu.vector_store %arg6[%c0_7, %c0_8], %10 {strides = array<i32>} : memref<16x256xf32, #tpu.memory_space<vmem>>, vector<16x256xf32>,
    %c0_9 = arith.constant 0 : index
    %c0_10 = arith.constant 0 : index
    %12 = vector.load %arg8[%c0_9, %c0_10] : memref<16x256xf32, #tpu.memory_space<vmem>>, vector<16x256xf32>
    %c0_11 = arith.constant 0 : index
    %c0_12 = arith.constant 0 : index
    %13 = vector.load %arg5[%c0_11, %c0_12] : memref<256x256xf32, #tpu.memory_space<vmem>>, vector<256x256xf32>
    %cst_13 = arith.constant dense<0.000000e+00> : vector<16x256xf32>
    %14 = tpu.matmul %10, %13, %cst_13 {dimension_numbers = #tpu.dot_dimension_numbers<[1], [0], [0], [1], [0, 0, 1, 1], [], []>} : vector<16x256xf32>, vector<256x256xf32>, vector<16x256xf32> -> vector<16x256xf32>
    %15 = arith.addf %12, %14 : vector<16x256xf32>
    %c0_14 = arith.constant 0 : index
    %c0_15 = arith.constant 0 : index
    %16 = vector.load %arg8[%c0_14, %c0_15] : memref<16x256xf32, #tpu.memory_space<vmem>>, vector<16x256xf32>
    tpu.vector_store %arg8[%c0_14, %c0_15], %15 {strides = array<i32>} : memref<16x256xf32, #tpu.memory_space<vmem>>, vector<16x256xf32>,
    %c1_i32 = arith.constant 1 : i32
    %17 = arith.cmpi eq, %arg1, %c1_i32 : i32
    %18 = arith.extui %17 : i1 to i32
    %c0_i32_16 = arith.constant 0 : i32
    %19 = arith.cmpi ne, %18, %c0_i32_16 : i32
    scf.if %19 {
      %c0_17 = arith.constant 0 : index
      %c0_18 = arith.constant 0 : index
      %20 = vector.load %arg8[%c0_17, %c0_18] : memref<16x256xf32, #tpu.memory_space<vmem>>, vector<16x256xf32>
      %c0_19 = arith.constant 0 : index
      %c0_20 = arith.constant 0 : index
      %21 = vector.load %arg7[%c0_19, %c0_20] : memref<16x256xf32, #tpu.memory_space<vmem>>, vector<16x256xf32>
      tpu.vector_store %arg7[%c0_19, %c0_20], %20 {strides = array<i32>} : memref<16x256xf32, #tpu.memory_space<vmem>>, vector<16x256xf32>,
    } else {
    }
    return
  }
  func.func @transform_0(%arg0: i32, %arg1: i32) -> (i32, i32) {
    %c0_i32 = arith.constant 0 : i32
    %c0_i32_0 = arith.constant 0 : i32
    return %arg0, %c0_i32 : i32, i32
  }
  func.func @transform_1(%arg0: i32, %arg1: i32) -> (i32, i32) {
    %c0_i32 = arith.constant 0 : i32
    %c0_i32_0 = arith.constant 0 : i32
    return %c0_i32, %arg1 : i32, i32
  }
  func.func @transform_2(%arg0: i32, %arg1: i32) -> (i32, i32) {
    %c0_i32 = arith.constant 0 : i32
    %c0_i32_0 = arith.constant 0 : i32
    return %c0_i32, %arg1 : i32, i32
  }
  func.func @transform_3(%arg0: i32, %arg1: i32) -> (i32, i32) {
    %c0_i32 = arith.constant 0 : i32
    %c0_i32_0 = arith.constant 0 : i32
    return %arg1, %c0_i32 : i32, i32
  }
  func.func @transform_4(%arg0: i32, %arg1: i32) -> (i32, i32) {
    %c0_i32 = arith.constant 0 : i32
    return %arg0, %arg1 : i32, i32
  }
  func.func @transform_5(%arg0: i32, %arg1: i32) -> (i32, i32) {
    %c0_i32 = arith.constant 0 : i32
    %c0_i32_0 = arith.constant 0 : i32
    return %arg0, %c0_i32 : i32, i32
  }
}

</mosaic_0001>

<bundles_post_ra>
// kernel: sparse_autoencoder_forward.1
= control target key start
LH: loop header
LB: loop body
LE: loop exit
PB: predicated region body
PF: predicated region fallthrough
CT: control target
= control target key end

     0   :  { %s1845_s0 = inlined_call_operand.vmem [shape: f32[32,256], index: 0, kind: input, shape index: {}]   ;;  %s1846_s1 = inlined_call_operand.hbm [shape: f32[256,512], index: 1, kind: input, shape index: {}]   ;;  %s1847_s2 = inlined_call_operand.vmem [shape: f32[1,512], index: 2, kind: input, shape index: {}]   ;;  %s1848_s3 = inlined_call_operand.hbm [shape: f32[512,256], index: 3, kind: input, shape index: {}]   ;;  %s1849_s4 = inlined_call_operand.hbm [shape: f32[32,512], index: 4, kind: output, shape index: {0}]   ;;  %s1850_s5 = inlined_call_operand.hbm [shape: f32[32,256], index: 5, kind: output, shape index: {1}]  }
   0x1   :  { %1866 = sst [smem:[#allocation29_spill]] %s1846_s1 }
   0x2   :  { %1867 = sst [smem:[#allocation30_spill]] %s1850_s5 }
   0x3   :  { %11 = vsyncpa [#allocation4], 0 }
   0x4   :  { %13 = vsyncpa [#allocation4 + $0x1], 0 }
   0x5   :  { %14 = vsyncpa [#allocation7], 0 }
   0x6   :  { %16 = vsyncpa [#allocation7 + $0x1], 0 }
   0x7   :  { %17 = vsyncpa [#allocation5], 0 }
   0x8   :  { %19 = vsyncpa [#allocation5 + $0x1], 0 }
   0x9   :  { %20 = vsyncpa [#allocation10], 0 }
   0xa   :  { %22 = vsyncpa [#allocation10 + $0x1], 0  ;;  %s1358_s18 = smov 0   ;;  %s1360_s19 = smov 0  }
   0xb   :  { %s1362_s20 = smov 0   ;;  %s1364_s21 = smov 0  }
   0xc   :  { %s1366_s22 = smov 0   ;;  %s1368_s23 = smov 0  }
   0xd   :  { %s1370_s24 = smov 0   ;;  %s1372_s25 = smov 0  }
   0xe   :  { %s1374_s26 = smov 0   ;;  %s1376_s27 = smov 0  }
   0xf   :  { %s1378_s28 = smov 0   ;;  %s1380_s29 = smov 0  }
  0x10   :  { %s1382_s30 = smov 0   ;;  %s1384_s6 = smov 0  }
  0x11 LB: > { %1868 = sst [smem:[#allocation15_spill]] %s1263_s18  ;;  %s898_s7 = sadd.s32 4294967295, %s1315_s6   ;;  %s1315_s6 = sphi %s1384_s6, %s28_s6   ;;  %s1311_s30 = sphi %s1382_s30, %s1910_s30   ;;  %s1307_s29 = sphi %s1380_s29, %s1919_s29   ;;  %s1303_s28 = sphi %s1378_s28, %s1908_s28   ;;  %s1299_s27 = sphi %s1376_s27, %s1918_s27   ;;  %s1295_s26 = sphi %s1374_s26, %s1907_s26   ;;  %s1291_s25 = sphi %s1372_s25, %s1917_s25   ;;  %s1287_s24 = sphi %s1370_s24, %s1916_s24   ;;  %s1283_s23 = sphi %s1368_s23, %s1905_s23   ;;  %s1279_s22 = sphi %s1366_s22, %s1915_s22   ;;  %s1275_s21 = sphi %s1364_s21, %s1914_s21   ;;  %s1271_s20 = sphi %s1362_s20, %s1903_s20   ;;  %s1267_s19 = sphi %s1360_s19, %s1913_s19   ;;  %s1263_s18 = sphi %s1358_s18, %s1912_s18  }
  0x12   : > { %1869 = sst [smem:[#allocation16_spill]] %s1271_s20  ;;  %s899_s8 = sadd.s32 4294967294, %s1315_s6  }
  0x13   : > { %1870 = sst [smem:[#allocation17_spill]] %s1275_s21  ;;  %s37_s9 = sadd.s32 1, %s1307_s29 }
  0x14   : > { %1871 = sst [smem:[#allocation18_spill]] %s1283_s23  ;;  %s40_s10 = sadd.s32 1, %s1311_s30 }
  0x15   : > { %1872 = sst [smem:[#allocation19_spill]] %s1295_s26  ;;  %p38_p0 = scmp.ge.s32.totalorder %s37_s9, 2 }
  0x16   : > { %1873 = sst [smem:[#allocation20_spill]] %s1311_s30  ;;  %s73_s11 = sadd.s32 1, %s1295_s26 }
  0x17   : > { %p80_p1 = scmp.ne.s32.totalorder %s1295_s26, %s1291_s25  ;;  %p81_p2 = scmp.eq.s32.totalorder %s1315_s6, 0 }
  0x18   : > { %s1921_s9 = smov (%p38_p0, %s37_s9), 0  ;;  %s1923_s10 = smov (!%p38_p0, %s40_s10), %s1311_s30 }
  0x19   : > { %1874 = sst [smem:[#allocation21_spill]] %s1921_s9  ;;  %s70_s12 = ssub.s32 %s1307_s29, %s1921_s9 }
  0x1a   : > { %p1439_p3 = por %p81_p2, %p80_p1  ;;  %p42_p4 = scmp.ge.s32.totalorder %s1923_s10, 2 }
  0x1b   : > { %p71_p5 = scmp.eq.s32.totalorder %s70_s12, 0  ;;  %p86_p6 = scmp.ne.s32.totalorder %s1291_s25, %s1287_s24 }
  0x1c   : > { %p87_p7 = scmp.eq.s32.totalorder %s898_s7, 0  ;;  %s1925_s10 = smov (%p42_p4, %s1923_s10), 0 }
  0x1d   : > { %1876 = sst [smem:[#allocation22_spill]] %s1925_s10  ;;  %s148_s16 = ssub.s32 %s1311_s30, %s1925_s10 }
  0x1e   : > { %s1447_s14 = scalar_select %p71_p5, %s1295_s26, %s73_s11  }
  0x1f   : > { %p1449_p8 = por %p87_p7, %p86_p6  ;;  %s150_s17 = sor.u32 %s148_s16, %s70_s12 }
  0x20   : > { %1877 = sst [smem:[#allocation23_spill]] %s1447_s14  ;;  %s153_s24 = sadd.s32 1, %s1283_s23 }
  0x21   : > { %p151_p9 = scmp.eq.s32.totalorder %s150_s17, 0  ;;  %p163_p10 = scmp.ne.s32.totalorder %s1283_s23, %s1279_s22 }
  0x22   : > { %p164_p11 = scmp.eq.s32.totalorder %s898_s7, 3  ;;  %p169_p12 = scmp.ne.s32.totalorder %s1279_s22, %s1275_s21 }
  0x23   : > { %s1461_s9 = scalar_select %p151_p9, %s1283_s23, %s153_s24  }
  0x24   : > { %p1463_p13 = por %p164_p11, %p163_p10  ;;  %p170_p0 = scmp.eq.s32.totalorder %s899_s8, 3 }
  0x25   : > { %1879 = sst [smem:[#allocation24_spill]] %s1461_s9  ;;  %p177_p1 = scmp.eq.s32.totalorder %s148_s16, 0 }
  0x26   : > { %s179_s10 = sadd.s32 1, %s1271_s20  ;;  %p1468_p2 = por %p170_p0, %p169_p12 }
  0x27   : > { %p189_p4 = scmp.ne.s32.totalorder %s1271_s20, %s1267_s19  ;;  %p195_p6 = scmp.ne.s32.totalorder %s1267_s19, %s1263_s18 }
  0x28   : > { %s1881_s12 = scalar_select %p1468_p2, 1, 0 }
  0x29   : > { %s1475_s17 = scalar_select %p177_p1, %s1271_s20, %s179_s10  }
  0x2a   : > { %1882 = sst [smem:[#allocation25_spill]] %s1881_s12  ;;  %p1477_p5 = por %p189_p4, %p164_p11 }
  0x2b   : > { %1883 = sst [smem:[#allocation26_spill]] %s1475_s17  ;;  %p960_p7 = scmp.lt.s32.totalorder %s1315_s6, 4 }
  0x2c   : > { %s1884_s7 = scalar_select %p1477_p5, 1, 0 }
  0x2d   : > { %p1484_p9 = por %p195_p6, %p170_p0  ;;  %s1489_s8 = sand.u32 1, %s1295_s26  }
  0x2e   : > { %1885 = sst [smem:[#allocation27_spill]] %s1884_s7  ;;  %s1858_s16 = sshll.u32 %s1489_s8, 9 }
  0x2f   : > { %s1886_s24 = scalar_select %p1484_p9, 1, 0 }
  0x30   : > { %s931_s30 = sshll.u32 %s1307_s29, 8  ;;  %s1888_s1 = sld [smem:[#allocation29_spill]] }
  0x31   : > { %1887 = sst [smem:[#allocation28_spill]] %s1886_s24  ;;  %s230_s23 = scalar_lea.vmem [#allocation3], %s1858_s16 }
  0x32   : > { %s237_s17 = sshll.u32 %s230_s23, 4  ;;  %p1500_p10 = pnand %p960_p7, %p1439_p3  ;;  %s238_s17 = int_to_ptr.vmem [resolvable:$true] %s237_s17 }
  0x33   : > { %s227_s26 = scalar_lea.sflag [#allocation4], %s1489_s8  ;;  %s1094_s24 = scalar_lea.vmem %s238_s17, 8192 }
  0x34   : > { %p1859_p11 = pneg %p1500_p10  ;;  %p1095_p12 = scmp.ne.s32.totalorder %s238_s17, %s1094_s24 }
  0x36   : > { %s236_s9 = scalar_lea.hbm %s1888_s1, %s931_s30  ;;  %p1097_p0 = pnand %p1095_p12, %p1859_p11 }
  0x37   : > { %s1317_s30 = smov [#allocation3]  }
  0x38   : > { %p1098_p1 = pneg %p1097_p0  ;;  %s1099_s14 = sshll.u32 %s1317_s30, 4  ;;  %s1100_s14 = int_to_ptr.vmem [resolvable:$false] %s1099_s14 }
  0x39   : > { %s1101_s23 = scalar_lea.vmem %s1100_s14, 16384  ;;  %p1102_p4 = scmp.lt.s32.totalorder %s238_s17, %s1100_s14 }
  0x3a   : > { %p1103_p3 = scmp.lt.s32.totalorder %s1101_s23, %s1094_s24 }
  0x3c   : > { %p1104_p6 = por %p1103_p3, %p1102_p4 }
  0x3e   : > { %p1105_p7 = pnand %p1104_p6, %p1098_p1 }
  0x40   : > { %1108 = shalt.err (!%p1105_p7)
}
  0x41   : > { %s1318_s13 = smov 512   ;;  %s1319_s10 = smov 256  }
  0x42   : > { %s1320_s16 = smov 16   ;;  %p909_p12 = scmp.ge.s32.totalorder %s1315_s6, 1 }
  0x43   : > { %949 = dma.hbm_to_vmem [thread:$0]  (!%p1500_p10), %s236_s9, 8192, %s238_s17, %s227_s26, %s1318_s13, %s1319_s10, %s1320_s16  }
  0x44   : > { %p275_p0 = scmp.lt.s32.totalorder %s1315_s6, 5  ;;  %s933_s24 = sshll.u32 %s1307_s29, 13 }
  0x45   : > { %s266_s1 = scalar_lea.hbm %s1848_s3, %s933_s24  ;;  %s1891_s18 = sshll.u32 %s1489_s8, 9 }
  0x46   : > { %p1514_p11 = pnand %p909_p12, %p275_p0  ;;  %s259_s12 = scalar_lea.vmem [#allocation6], %s1891_s18 }
  0x47   : > { %s267_s21 = sshll.u32 %s259_s12, 4  ;;  %s256_s5 = scalar_lea.sflag [#allocation7], %s1489_s8  ;;  %s268_s21 = int_to_ptr.vmem [resolvable:$true] %s267_s21 }
  0x48   : > { %s1122_s7 = scalar_lea.vmem %s268_s21, 8192  ;;  %p1892_p4 = pneg %p1500_p10 }
  0x49   : > { %p1123_p1 = scmp.ne.s32.totalorder %s268_s21, %s1122_s7  ;;  %s1321_s26 = smov [#allocation6]  }
  0x4a   : > { %s1127_s9 = sshll.u32 %s1321_s26, 4  ;;  %s1128_s9 = int_to_ptr.vmem [resolvable:$false] %s1127_s9 }
  0x4b   : > { %p1125_p3 = pnand %p1123_p1, %p1892_p4  ;;  %s1129_s17 = scalar_lea.vmem %s1128_s9, 16384 }
  0x4c   : > { %p1130_p7 = scmp.lt.s32.totalorder %s268_s21, %s1128_s9  ;;  %p1131_p12 = scmp.lt.s32.totalorder %s1129_s17, %s1122_s7 }
  0x4d   : > { %p1126_p6 = pneg %p1125_p3 }
  0x4e   : > { %p1132_p0 = por %p1131_p12, %p1130_p7 }
  0x50   : > { %p1133_p9 = pnand %p1132_p0, %p1126_p6 }
  0x52   : > { %1136 = shalt.err (!%p1133_p9)
}
  0x53   : > { %952 = dma.hbm_to_vmem [thread:$0]  (!%p1500_p10), %s266_s1, 8192, %s268_s21, %s256_s5, %s1319_s10, %s1319_s10, %s1320_s16  }
  0x54   : > { %279 = sbr.rel (%p1514_p11) target bundleno = 632 (0x278), region = 36  ;;  %s281_s18 = sand.u32 (!%p1514_p11), 1, %s1291_s25  }
  0x55   : > { %s910_s12 = sshll.u32 (!%p1514_p11), %s281_s18, 9  ;;  %s282_s8 = scalar_lea.sflag (!%p1514_p11), [#allocation4], %s281_s18 }
  0x56   : > { %s1533_s13 = scalar_lea.vmem (!%p1514_p11), [#allocation3], %s910_s12 }
  0x59   : > { %1246 = dma.done.wait (%p1449_p8), %s282_s8, 8192  }
  0x5a   : > { %1248 = vsyncadd (%p1449_p8), %s282_s8, 4294959104  ;;  %s291_s7 = scalar_lea.sflag [#allocation7], %s281_s18  ;;  %s1539_s24 = scalar_lea.vmem [#allocation6], %s910_s12 }
  0x5b   : > { %1250 = dma.done.wait (%p1449_p8), %s291_s7, 8192  }
  0x5c   : > { %1252 = vsyncadd (%p1449_p8), %s291_s7, 4294959104  ;;  %s331_s1 = sand.u32 1, %s1279_s22   ;;  %s338_s5 = sand.u32 1, %s1267_s19  }
  0x5d   : > { %s912_s20 = sshll.u32 %s331_s1, 5  ;;  %s913_s21 = sshll.u32 %s338_s5, 5 }
  0x5e   : > { %s914_s16 = sshll.u32 %s1303_s28, 1  ;;  %s1553_s10 = sshll.u32 %s1299_s27, 1 }
  0x5f   : > { %p342_p9 = scmp.lt.s32.totalorder %s914_s16, 3  ;;  %p350_p10 = scmp.lt.s32.totalorder %s1553_s10, 3 }
  0x60   : > { %s1568_s12 = scalar_lea.vmem [#allocation8], %s912_s20  ;;  %s1570_s8 = scalar_lea.vmem [#allocation9], %s913_s21 }
  0x61   : > { %s1927_s16 = smov (!%p342_p9, %s914_s16), 3  ;;  %p918_p8 = scmp.ne.s32.totalorder %s1299_s27, 0 }
  0x62   : > { %s1557_s15 = scalar_select %p350_p10, %s1553_s10, 3 }
  0x63   : > { %s934_s30 = sshll.u32 %s1927_s16, 4  ;;  %361 = sbr.rel (%p918_p8) target bundleno = 107 (0x6b), region = 48 }
  0x64   : > { %s1562_s26 = scalar_lea.vmem %s1845_s0, %s934_s30  ;;  %s352_s18 = scalar_lea.vmem %s1847_s2, %s1557_s15 }
  0x68   : > { %v1322_v0 = vmov 0.0  }
  0x69   : > { %362 = vst [vmem:[#allocation2 + $0x10] sm:$0xff] %v1322_v0  ;;  %363 = vst [vmem:[#allocation2] sm:$0xff] %v1322_v0 }
  0x6a   : > { %364 = vst [vmem:[#allocation2 + $0x18] sm:$0xff] %v1322_v0  ;;  %365 = vst [vmem:[#allocation2 + $0x8] sm:$0xff] %v1322_v0 }
  0x6b PF: > { %v401_v1 = vld [vmem:[%s1533_s13 + $0xf8] sm:$0xff]  ;;  %v400_v2 = vld [vmem:[%s1533_s13 + $0xf0] sm:$0xff]  ;;  %v399_v3 = vld [vmem:[%s1533_s13 + $0xe8] sm:$0xff]  ;;  %p919_p11 = scmp.ne.s32.totalorder %s1299_s27, 1 }
  0x6c   : > { %446 = vmatprep.subr.mxu0 %v401_v1  ;;  %v398_v4 = vld [vmem:[%s1533_s13 + $0xe0] sm:$0xff]  ;;  %v397_v5 = vld [vmem:[%s1533_s13 + $0xd8] sm:$0xff]  ;;  %v396_v6 = vld [vmem:[%s1533_s13 + $0xd0] sm:$0xff] }
  0x6d   : > { %447 = vmatpush1.msra.mxu0 %v400_v2  ;;  %v395_v7 = vld [vmem:[%s1533_s13 + $0xc8] sm:$0xff]  ;;  %v394_v8 = vld [vmem:[%s1533_s13 + $0xc0] sm:$0xff]  ;;  %v393_v9 = vld [vmem:[%s1533_s13 + $0xb8] sm:$0xff] }
  0x6e   : > { %448 = vmatprep.subr.mxu0 %v399_v3  ;;  %v392_v10 = vld [vmem:[%s1533_s13 + $0xb0] sm:$0xff]  ;;  %v391_v11 = vld [vmem:[%s1533_s13 + $0xa8] sm:$0xff]  ;;  %v390_v12 = vld [vmem:[%s1533_s13 + $0xa0] sm:$0xff] }
  0x6f   : > { %449 = vmatpush1.msra.mxu0 %v398_v4  ;;  %v389_v13 = vld [vmem:[%s1533_s13 + $0x98] sm:$0xff]  ;;  %v388_v14 = vld [vmem:[%s1533_s13 + $0x90] sm:$0xff]  ;;  %v387_v15 = vld [vmem:[%s1533_s13 + $0x88] sm:$0xff] }
  0x70   : > { %450 = vmatprep.subr.mxu0 %v397_v5  ;;  %v386_v16 = vld [vmem:[%s1533_s13 + $0x80] sm:$0xff]  ;;  %v385_v17 = vld [vmem:[%s1533_s13 + $0x78] sm:$0xff]  ;;  %v384_v18 = vld [vmem:[%s1533_s13 + $0x70] sm:$0xff] }
  0x71   : > { %451 = vmatpush1.msra.mxu0 %v396_v6  ;;  %v383_v19 = vld [vmem:[%s1533_s13 + $0x68] sm:$0xff]  ;;  %v382_v20 = vld [vmem:[%s1533_s13 + $0x60] sm:$0xff]  ;;  %v381_v21 = vld [vmem:[%s1533_s13 + $0x58] sm:$0xff] }
  0x72   : > { %452 = vmatprep.subr.mxu0 %v395_v7  ;;  %v380_v22 = vld [vmem:[%s1533_s13 + $0x50] sm:$0xff]  ;;  %v379_v23 = vld [vmem:[%s1533_s13 + $0x48] sm:$0xff]  ;;  %v378_v24 = vld [vmem:[%s1533_s13 + $0x40] sm:$0xff] }
  0x73   : > { %453 = vmatpush1.msra.mxu0 %v394_v8  ;;  %v367_v25 = vld [vmem:[%s1562_s26 + $0x8] sm:$0xff]  ;;  %v377_v26 = vld [vmem:[%s1533_s13 + $0x38] sm:$0xff]  ;;  %v376_v27 = vld [vmem:[%s1533_s13 + $0x30] sm:$0xff] }
  0x74   : > { %454 = vmatprep.subr.mxu0 %v393_v9  ;;  %510 = vmatprep.mubr.f32.mxu0 %v367_v25  ;;  %v566_v28 = vld [vmem:[%s1539_s24 + $0xf8] sm:$0xff]  ;;  %v565_v29 = vld [vmem:[%s1539_s24 + $0xf0] sm:$0xff]  ;;  %v564_v30 = vld [vmem:[%s1539_s24 + $0xe8] sm:$0xff] }
  0x75   : > { %455 = vmatpush1.msra.mxu0 %v392_v10  ;;  %599 = vmatprep.subr.mxu1 %v566_v28  ;;  %v563_v31 = vld [vmem:[%s1539_s24 + $0xe0] sm:$0xff]  ;;  %v375_v32 = vld [vmem:[%s1533_s13 + $0x28] sm:$0xff]  ;;  %v562_v33 = vld [vmem:[%s1539_s24 + $0xd8] sm:$0xff] }
  0x76   : > { %456 = vmatprep.subr.mxu0 %v391_v11  ;;  %600 = vmatpush1.msra.mxu1 %v565_v29  ;;  %v374_v34 = vld [vmem:[%s1533_s13 + $0x20] sm:$0xff]  ;;  %v561_v35 = vld [vmem:[%s1539_s24 + $0xd0] sm:$0xff]  ;;  %v373_v36 = vld [vmem:[%s1533_s13 + $0x18] sm:$0xff] }
  0x77   : > { %457 = vmatpush1.msra.mxu0 %v390_v12  ;;  %601 = vmatprep.subr.mxu1 %v564_v30  ;;  %v560_v37 = vld [vmem:[%s1539_s24 + $0xc8] sm:$0xff]  ;;  %v372_v38 = vld [vmem:[%s1533_s13 + $0x10] sm:$0xff]  ;;  %v559_v39 = vld [vmem:[%s1539_s24 + $0xc0] sm:$0xff] }
  0x78   : > { %458 = vmatprep.subr.mxu0 %v389_v13  ;;  %602 = vmatpush1.msra.mxu1 %v563_v31  ;;  %v371_v40 = vld [vmem:[%s1533_s13 + $0x8] sm:$0xff]  ;;  %v558_v41 = vld [vmem:[%s1539_s24 + $0xb8] sm:$0xff]  ;;  %v370_v42 = vld [vmem:[%s1533_s13] sm:$0xff] }
  0x79   : > { %459 = vmatpush1.msra.mxu0 %v388_v14  ;;  %603 = vmatprep.subr.mxu1 %v562_v33  ;;  %v557_v43 = vld [vmem:[%s1539_s24 + $0xb0] sm:$0xff]  ;;  %v433_v44 = vld [vmem:[%s1533_s13 + $0x1f8] sm:$0xff]  ;;  %v556_v45 = vld [vmem:[%s1539_s24 + $0xa8] sm:$0xff] }
  0x7a   : > { %460 = vmatprep.subr.mxu0 %v387_v15  ;;  %604 = vmatpush1.msra.mxu1 %v561_v35  ;;  %v432_v46 = vld [vmem:[%s1533_s13 + $0x1f0] sm:$0xff]  ;;  %v555_v47 = vld [vmem:[%s1539_s24 + $0xa0] sm:$0xff]  ;;  %v431_v48 = vld [vmem:[%s1533_s13 + $0x1e8] sm:$0xff] }
  0x7b   : > { %461 = vmatpush1.msra.mxu0 %v386_v16  ;;  %605 = vmatprep.subr.mxu1 %v560_v37  ;;  %v554_v49 = vld [vmem:[%s1539_s24 + $0x98] sm:$0xff]  ;;  %v430_v50 = vld [vmem:[%s1533_s13 + $0x1e0] sm:$0xff]  ;;  %v553_v51 = vld [vmem:[%s1539_s24 + $0x90] sm:$0xff] }
  0x7c   : > { %462 = vmatprep.subr.mxu0 %v385_v17  ;;  %606 = vmatpush1.msra.mxu1 %v559_v39  ;;  %v429_v52 = vld [vmem:[%s1533_s13 + $0x1d8] sm:$0xff]  ;;  %v552_v53 = vld [vmem:[%s1539_s24 + $0x88] sm:$0xff]  ;;  %v428_v54 = vld [vmem:[%s1533_s13 + $0x1d0] sm:$0xff] }
  0x7d   : > { %463 = vmatpush1.msra.mxu0 %v384_v18  ;;  %607 = vmatprep.subr.mxu1 %v558_v41  ;;  %v551_v55 = vld [vmem:[%s1539_s24 + $0x80] sm:$0xff]  ;;  %v427_v56 = vld [vmem:[%s1533_s13 + $0x1c8] sm:$0xff]  ;;  %v550_v57 = vld [vmem:[%s1539_s24 + $0x78] sm:$0xff] }
  0x7e   : > { %464 = vmatprep.subr.mxu0 %v383_v19  ;;  %608 = vmatpush1.msra.mxu1 %v557_v43  ;;  %v426_v58 = vld [vmem:[%s1533_s13 + $0x1c0] sm:$0xff]  ;;  %v549_v59 = vld [vmem:[%s1539_s24 + $0x70] sm:$0xff]  ;;  %v425_v60 = vld [vmem:[%s1533_s13 + $0x1b8] sm:$0xff] }
  0x7f   : > { %465 = vmatpush1.msra.mxu0 %v382_v20  ;;  %609 = vmatprep.subr.mxu1 %v556_v45  ;;  %v548_v61 = vld [vmem:[%s1539_s24 + $0x68] sm:$0xff]  ;;  %v424_v62 = vld [vmem:[%s1533_s13 + $0x1b0] sm:$0xff]  ;;  %v547_v63 = vld [vmem:[%s1539_s24 + $0x60] sm:$0xff] }
  0x80   : > { %466 = vmatprep.subr.mxu0 %v381_v21  ;;  %610 = vmatpush1.msra.mxu1 %v555_v47  ;;  %v423_v0 = vld [vmem:[%s1533_s13 + $0x1a8] sm:$0xff]  ;;  %v546_v1 = vld [vmem:[%s1539_s24 + $0x58] sm:$0xff]  ;;  %v422_v2 = vld [vmem:[%s1533_s13 + $0x1a0] sm:$0xff] }
  0x81   : > { %467 = vmatpush1.msra.mxu0 %v380_v22  ;;  %611 = vmatprep.subr.mxu1 %v554_v49  ;;  %v545_v3 = vld [vmem:[%s1539_s24 + $0x50] sm:$0xff]  ;;  %v421_v4 = vld [vmem:[%s1533_s13 + $0x198] sm:$0xff]  ;;  %v544_v5 = vld [vmem:[%s1539_s24 + $0x48] sm:$0xff] }
  0x82   : > { %468 = vmatprep.subr.mxu0 %v379_v23  ;;  %612 = vmatpush1.msra.mxu1 %v553_v51  ;;  %v420_v6 = vld [vmem:[%s1533_s13 + $0x190] sm:$0xff]  ;;  %v543_v7 = vld [vmem:[%s1539_s24 + $0x40] sm:$0xff]  ;;  %v419_v8 = vld [vmem:[%s1533_s13 + $0x188] sm:$0xff] }
  0x83   : > { %469 = vmatpush1.msra.mxu0 %v378_v24  ;;  %613 = vmatprep.subr.mxu1 %v552_v53  ;;  %v542_v9 = vld [vmem:[%s1539_s24 + $0x38] sm:$0xff]  ;;  %v418_v10 = vld [vmem:[%s1533_s13 + $0x180] sm:$0xff]  ;;  %v541_v11 = vld [vmem:[%s1539_s24 + $0x30] sm:$0xff] }
  0x84   : > { %470 = vmatprep.subr.mxu0 %v377_v26  ;;  %614 = vmatpush1.msra.mxu1 %v551_v55  ;;  %v417_v12 = vld [vmem:[%s1533_s13 + $0x178] sm:$0xff]  ;;  %v540_v13 = vld [vmem:[%s1539_s24 + $0x28] sm:$0xff]  ;;  %v416_v14 = vld [vmem:[%s1533_s13 + $0x170] sm:$0xff] }
  0x85   : > { %471 = vmatpush1.msra.mxu0 %v376_v27  ;;  %615 = vmatprep.subr.mxu1 %v550_v57  ;;  %v539_v15 = vld [vmem:[%s1539_s24 + $0x20] sm:$0xff]  ;;  %v415_v16 = vld [vmem:[%s1533_s13 + $0x168] sm:$0xff]  ;;  %v538_v17 = vld [vmem:[%s1539_s24 + $0x18] sm:$0xff] }
  0x86   : > { %472 = vmatprep.subr.mxu0 %v375_v32  ;;  %616 = vmatpush1.msra.mxu1 %v549_v59  ;;  %v414_v18 = vld [vmem:[%s1533_s13 + $0x160] sm:$0xff]  ;;  %v537_v19 = vld [vmem:[%s1539_s24 + $0x10] sm:$0xff]  ;;  %v413_v20 = vld [vmem:[%s1533_s13 + $0x158] sm:$0xff] }
  0x87   : > { %473 = vmatpush1.msra.mxu0 %v374_v34  ;;  %617 = vmatprep.subr.mxu1 %v548_v61  ;;  %v536_v21 = vld [vmem:[%s1539_s24 + $0x8] sm:$0xff]  ;;  %v412_v22 = vld [vmem:[%s1533_s13 + $0x150] sm:$0xff]  ;;  %v535_v23 = vld [vmem:[%s1539_s24] sm:$0xff] }
  0x88   : > { %474 = vmatprep.subr.mxu0 %v373_v36  ;;  %618 = vmatpush1.msra.mxu1 %v547_v63  ;;  %v411_v24 = vld [vmem:[%s1533_s13 + $0x148] sm:$0xff]  ;;  %v598_v25 = vld [vmem:[%s1539_s24 + $0x1f8] sm:$0xff]  ;;  %v410_v26 = vld [vmem:[%s1533_s13 + $0x140] sm:$0xff] }
  0x89   : > { %475 = vmatpush1.msra.mxu0 %v372_v38  ;;  %619 = vmatprep.subr.mxu1 %v546_v1  ;;  %v597_v27 = vld [vmem:[%s1539_s24 + $0x1f0] sm:$0xff]  ;;  %v409_v28 = vld [vmem:[%s1533_s13 + $0x138] sm:$0xff]  ;;  %v596_v29 = vld [vmem:[%s1539_s24 + $0x1e8] sm:$0xff] }
  0x8a   : > { %476 = vmatprep.subr.mxu0 %v371_v40  ;;  %620 = vmatpush1.msra.mxu1 %v545_v3  ;;  %v408_v30 = vld [vmem:[%s1533_s13 + $0x130] sm:$0xff]  ;;  %v595_v31 = vld [vmem:[%s1539_s24 + $0x1e0] sm:$0xff]  ;;  %v407_v32 = vld [vmem:[%s1533_s13 + $0x128] sm:$0xff] }
  0x8b   : > { %477 = vmatpush1.msra.mxu0 %v370_v42  ;;  %621 = vmatprep.subr.mxu1 %v544_v5  ;;  %v594_v33 = vld [vmem:[%s1539_s24 + $0x1d8] sm:$0xff]  ;;  %v406_v34 = vld [vmem:[%s1533_s13 + $0x120] sm:$0xff]  ;;  %v593_v35 = vld [vmem:[%s1539_s24 + $0x1d0] sm:$0xff]  ;;  %v436_v5 = vlaneseq }
  0x8c   : > { %478 = vmatprep.subr.mxu0 %v433_v44  ;;  %622 = vmatpush1.msra.mxu1 %v543_v7  ;;  %v405_v36 = vld [vmem:[%s1533_s13 + $0x118] sm:$0xff]  ;;  %v592_v37 = vld [vmem:[%s1539_s24 + $0x1c8] sm:$0xff]  ;;  %v404_v38 = vld [vmem:[%s1533_s13 + $0x110] sm:$0xff] }
  0x8d   : > { %479 = vmatpush2.msra.mxu0 %v432_v46  ;;  %623 = vmatprep.subr.mxu1 %v542_v9  ;;  %v591_v39 = vld [vmem:[%s1539_s24 + $0x1c0] sm:$0xff]  ;;  %v403_v40 = vld [vmem:[%s1533_s13 + $0x108] sm:$0xff]  ;;  %v590_v41 = vld [vmem:[%s1539_s24 + $0x1b8] sm:$0xff] }
  0x8e   : > { %480 = vmatprep.subr.mxu0 %v431_v48  ;;  %624 = vmatpush1.msra.mxu1 %v541_v11  ;;  %v402_v42 = vld [vmem:[%s1533_s13 + $0x100] sm:$0xff]  ;;  %v589_v43 = vld [vmem:[%s1539_s24 + $0x1b0] sm:$0xff]  ;;  %v588_v45 = vld [vmem:[%s1539_s24 + $0x1a8] sm:$0xff] }
  0x8f   : > { %481 = vmatpush2.msra.mxu0 %v430_v50  ;;  %625 = vmatprep.subr.mxu1 %v540_v13  ;;  %v366_v44 = vld [vmem:[%s1562_s26] sm:$0xff]  ;;  %v369_v46 = vld [vmem:[%s1562_s26 + $0x18] sm:$0xff]  ;;  %v585_v49 = vld [vmem:[%s1539_s24 + $0x190] sm:$0xff] }
  0x90   : > { %482 = vmatprep.subr.mxu0 %v429_v52  ;;  %626 = vmatpush1.msra.mxu1 %v539_v15  ;;  %v587_v47 = vld [vmem:[%s1539_s24 + $0x1a0] sm:$0xff]  ;;  %v586_v48 = vld [vmem:[%s1539_s24 + $0x198] sm:$0xff]  ;;  %v368_v50 = vld [vmem:[%s1562_s26 + $0x10] sm:$0xff] }
  0x91   : > { %483 = vmatpush2.msra.mxu0 %v428_v54  ;;  %627 = vmatprep.subr.mxu1 %v538_v17  ;;  %v584_v51 = vld [vmem:[%s1539_s24 + $0x188] sm:$0xff]  ;;  %v583_v52 = vld [vmem:[%s1539_s24 + $0x180] sm:$0xff]  ;;  %v582_v53 = vld [vmem:[%s1539_s24 + $0x178] sm:$0xff] }
  0x92   : > { %484 = vmatprep.subr.mxu0 %v427_v56  ;;  %628 = vmatpush1.msra.mxu1 %v537_v19  ;;  %v581_v54 = vld [vmem:[%s1539_s24 + $0x170] sm:$0xff]  ;;  %v580_v55 = vld [vmem:[%s1539_s24 + $0x168] sm:$0xff]  ;;  %v579_v56 = vld [vmem:[%s1539_s24 + $0x160] sm:$0xff] }
  0x93   : > { %485 = vmatpush2.msra.mxu0 %v426_v58  ;;  %629 = vmatprep.subr.mxu1 %v536_v21  ;;  %v578_v57 = vld [vmem:[%s1539_s24 + $0x158] sm:$0xff]  ;;  %v577_v58 = vld [vmem:[%s1539_s24 + $0x150] sm:$0xff]  ;;  %v576_v59 = vld [vmem:[%s1539_s24 + $0x148] sm:$0xff] }
  0x94   : > { %486 = vmatprep.subr.mxu0 %v425_v60  ;;  %630 = vmatpush1.msra.mxu1 %v535_v23  ;;  %v575_v60 = vld [vmem:[%s1539_s24 + $0x140] sm:$0xff]  ;;  %v574_v61 = vld [vmem:[%s1539_s24 + $0x138] sm:$0xff]  ;;  %v572_v63 = vld [vmem:[%s1539_s24 + $0x128] sm:$0xff] }
  0x95   : > { %487 = vmatpush2.msra.mxu0 %v424_v62  ;;  %631 = vmatprep.subr.mxu1 %v598_v25  ;;  %v573_v62 = vld [vmem:[%s1539_s24 + $0x130] sm:$0xff]  ;;  %v570_v1 = vld [vmem:[%s1539_s24 + $0x118] sm:$0xff]  ;;  %v568_v3 = vld [vmem:[%s1539_s24 + $0x108] sm:$0xff] }
  0x96   : > { %488 = vmatprep.subr.mxu0 %v423_v0  ;;  %632 = vmatpush2.msra.mxu1 %v597_v27  ;;  %v571_v0 = vld [vmem:[%s1539_s24 + $0x120] sm:$0xff] }
  0x97   : > { %489 = vmatpush2.msra.mxu0 %v422_v2  ;;  %633 = vmatprep.subr.mxu1 %v596_v29  ;;  %v569_v2 = vld [vmem:[%s1539_s24 + $0x110] sm:$0xff]  ;;  %v533_v29 = vld [vmem:[#allocation2 + $0x18] sm:$0xff] }
  0x98   : > { %490 = vmatprep.subr.mxu0 %v421_v4  ;;  %634 = vmatpush2.msra.mxu1 %v595_v31  ;;  %v567_v4 = vld [vmem:[%s1539_s24 + $0x100] sm:$0xff] }
  0x99   : > { %491 = vmatpush2.msra.mxu0 %v420_v6  ;;  %635 = vmatprep.subr.mxu1 %v594_v33  ;;  %v437_v6 = vshrl.u32 %v436_v5, 7 }
  0x9a   : > { %492 = vmatprep.subr.mxu0 %v419_v8  ;;  %636 = vmatpush2.msra.mxu1 %v593_v35  ;;  %v434_v8 = vld [vmem:[%s352_s18] sm:$0x3] }
  0x9b   : > { %493 = vmatpush2.msra.mxu0 %v418_v10  ;;  %637 = vmatprep.subr.mxu1 %v592_v37  ;;  %v438_v7 = vsub.s32 0, %v437_v6  ;;  %v442_v9 = vsub.s32 1, %v437_v6 }
  0x9c   : > { %494 = vmatprep.subr.mxu0 %v417_v12  ;;  %638 = vmatpush2.msra.mxu1 %v591_v39 }
  0x9d   : > { %495 = vmatpush2.msra.mxu0 %v416_v14  ;;  %639 = vmatprep.subr.mxu1 %v590_v41  ;;  %v439_v10 = vrot.slane %v434_v8, %v438_v7  ;;  %v443_v11 = vrot.slane %v434_v8, %v442_v9 }
  0x9e   : > { %496 = vmatprep.subr.mxu0 %v415_v16  ;;  %640 = vmatpush2.msra.mxu1 %v589_v43 }
  0x9f   : > { %497 = vmatpush2.msra.mxu0 %v414_v18  ;;  %641 = vmatprep.subr.mxu1 %v588_v45 }
  0xa0   : > { %498 = vmatprep.subr.mxu0 %v413_v20  ;;  %642 = vmatpush2.msra.mxu1 %v587_v47 }
  0xa1   : > { %499 = vmatpush2.msra.mxu0 %v412_v22  ;;  %643 = vmatprep.subr.mxu1 %v586_v48 }
  0xa2   : > { %500 = vmatprep.subr.mxu0 %v411_v24  ;;  %644 = vmatpush2.msra.mxu1 %v585_v49  ;;  %v531_v24 = vld [vmem:[#allocation2 + $0x10] sm:$0xff] }
  0xa3   : > { %501 = vmatpush2.msra.mxu0 %v410_v26  ;;  %645 = vmatprep.subr.mxu1 %v584_v51  ;;  %v532_v26 = vld [vmem:[#allocation2] sm:$0xff] }
  0xa4   : > { %502 = vmatprep.subr.mxu0 %v409_v28  ;;  %646 = vmatpush2.msra.mxu1 %v583_v52 }
  0xa5   : > { %503 = vmatpush2.msra.mxu0 %v408_v30  ;;  %647 = vmatprep.subr.mxu1 %v582_v53 }
  0xa6   : > { %504 = vmatprep.subr.mxu0 %v407_v32  ;;  %648 = vmatpush2.msra.mxu1 %v581_v54  ;;  %v534_v32 = vld [vmem:[#allocation2 + $0x8] sm:$0xff] }
  0xa7   : > { %505 = vmatpush2.msra.mxu0 %v406_v34  ;;  %649 = vmatprep.subr.mxu1 %v580_v55 }
  0xa8   : > { %506 = vmatprep.subr.mxu0 %v405_v36  ;;  %650 = vmatpush2.msra.mxu1 %v579_v56 }
  0xa9   : > { %507 = vmatpush2.msra.mxu0 %v404_v38  ;;  %651 = vmatprep.subr.mxu1 %v578_v57 }
  0xaa   : > { %508 = vmatprep.subr.mxu0 %v403_v40  ;;  %652 = vmatpush2.msra.mxu1 %v577_v58 }
  0xab   : > { %509 = vmatpush2.msra.mxu0 %v402_v42  ;;  %653 = vmatprep.subr.mxu1 %v576_v59 }
  0xac   : > { %511 = vmatmul.mubr.f32.vlgmr.msra.gmra.mxu0 %v366_v44  ;;  %654 = vmatpush2.msra.mxu1 %v575_v60 }
  0xad   : > { %516 = vmatprep.mubr.f32.mxu0 %v369_v46  ;;  %655 = vmatprep.subr.mxu1 %v574_v61 }
  0xae   : > { %656 = vmatpush2.msra.mxu1 %v573_v62 }
  0xaf   : > { %657 = vmatprep.subr.mxu1 %v572_v63 }
  0xb0   : > { %517 = vmatmul.mubr.f32.gmra.mxu0 %v368_v50  ;;  %658 = vmatpush2.msra.mxu1 %v571_v0 }
  0xb1   : > { %659 = vmatprep.subr.mxu1 %v570_v1 }
  0xb2   : > { %660 = vmatpush2.msra.mxu1 %v569_v2 }
  0xb3   : > { %661 = vmatprep.subr.mxu1 %v568_v3 }
  0xb4   : > { %662 = vmatpush2.msra.mxu1 %v567_v4 }
 0x16c   : > { %v512_v12 = vpop.f32.mrf.mxu0 }
 0x16d   : > { %v513_v13 = vadd.f32 %v512_v12, %v439_v10 }
 0x16e   : > { %v514_v14 = vpop.f32.mrf.mxu0 }
 0x16f   : > { %v523_v15 = vmax.f32 %v513_v13, 0.0  ;;  %v515_v16 = vadd.f32 %v514_v14, %v443_v11 }
 0x170   : > { %v518_v17 = vpop.f32.mrf.mxu0 }
 0x171   : > { %527 = vst [vmem:[%s1568_s12] sm:$0xff] %v523_v15  ;;  %v524_v18 = vmax.f32 %v515_v16, 0.0  ;;  %v519_v19 = vadd.f32 %v518_v17, %v439_v10 }
 0x172   : > { %v520_v20 = vpop.f32.mrf.mxu0 }
 0x173   : > { %528 = vst [vmem:[%s1568_s12 + $0x8] sm:$0xff] %v524_v18  ;;  %v525_v21 = vmax.f32 %v519_v19, 0.0  ;;  %v521_v22 = vadd.f32 %v520_v20, %v443_v11  ;;  %663 = vmatprep.mubr.f32.mxu1 %v524_v18 }
 0x174   : > { %664 = vmatmul.mubr.f32.vlgmr.msra.gmra.mxu1 %v523_v15 }
 0x175   : > { %529 = vst [vmem:[%s1568_s12 + $0x10] sm:$0xff] %v525_v21  ;;  %v526_v23 = vmax.f32 %v521_v22, 0.0 }
 0x177   : > { %530 = vst [vmem:[%s1568_s12 + $0x18] sm:$0xff] %v526_v23  ;;  %669 = vmatprep.mubr.f32.mxu1 %v526_v23 }
 0x178   : > { %670 = vmatmul.mubr.f32.gmra.mxu1 %v525_v21 }
 0x234   : > { %v665_v25 = vpop.f32.mrf.mxu1 }
 0x235   : > { %v676_v27 = vadd.f32 %v665_v25, %v531_v24 }
 0x236   : > { %v667_v28 = vpop.f32.mrf.mxu1 }
 0x237   : > { %680 = vst [vmem:[#allocation2 + $0x10] sm:$0xff] %v676_v27  ;;  %v677_v30 = vadd.f32 %v667_v28, %v532_v26 }
 0x238   : > { %v671_v31 = vpop.f32.mrf.mxu1 }
 0x239   : > { %681 = vst [vmem:[#allocation2] sm:$0xff] %v677_v30  ;;  %v678_v33 = vadd.f32 %v671_v31, %v533_v29  ;;  %687 = sbr.rel (%p919_p11) target bundleno = 582 (0x246), region = 52 }
 0x23a   : > { %v673_v34 = vpop.f32.mrf.mxu1 }
 0x23b   : > { %682 = vst [vmem:[#allocation2 + $0x18] sm:$0xff] %v678_v33  ;;  %v679_v35 = vadd.f32 %v673_v34, %v534_v32 }
 0x23d   : > { %683 = vst [vmem:[#allocation2 + $0x8] sm:$0xff] %v679_v35 }
 0x23e   : > { %v688_v36 = vld [vmem:[#allocation2 + $0x10] sm:$0xff] }
 0x23f   : > { %692 = vst [vmem:[%s1570_s8] sm:$0xff] %v688_v36 }
 0x240   : > { %v689_v37 = vld [vmem:[#allocation2] sm:$0xff] }
 0x241   : > { %693 = vst [vmem:[%s1570_s8 + $0x8] sm:$0xff] %v689_v37 }
 0x242   : > { %v690_v38 = vld [vmem:[#allocation2 + $0x18] sm:$0xff] }
 0x243   : > { %694 = vst [vmem:[%s1570_s8 + $0x10] sm:$0xff] %v690_v38 }
 0x244   : > { %v691_v39 = vld [vmem:[#allocation2 + $0x8] sm:$0xff] }
 0x245   : > { %695 = vst [vmem:[%s1570_s8 + $0x18] sm:$0xff] %v691_v39 }
 0x246 PF: > { %s935_s27 = sshll.u32 %s1303_s28, 3  ;;  %s718_s20 = sshll.u32 %s1568_s12, 4  ;;  %s1722_s20 = int_to_ptr.vmem [resolvable:$true] %s718_s20 }
 0x247   : > { %s715_s24 = sadd.s32 %s935_s27, %s1553_s10  ;;  %s1731_s14 = scalar_lea.sflag [#allocation5], %s331_s1 }
 0x248   : > { %s925_s21 = sshll.u32 %s715_s24, 7  ;;  %s1137_s23 = scalar_lea.vmem %s1722_s20, 512 }
 0x249   : > { %s1727_s30 = scalar_lea.hbm %s1849_s4, %s925_s21  ;;  %p1138_p1 = scmp.ne.s32.totalorder %s1722_s20, %s1137_s23 }
 0x24a   : > { %s1323_s10 = smov [#allocation8]  }
 0x24b   : > { %p1139_p4 = pnand %p1138_p1, %p1463_p13  ;;  %s1141_s26 = sshll.u32 %s1323_s10, 4  ;;  %s1142_s26 = int_to_ptr.vmem [resolvable:$false] %s1141_s26 }
 0x24c   : > { %s1143_s9 = scalar_lea.vmem %s1142_s26, 1024  ;;  %p1144_p6 = scmp.lt.s32.totalorder %s1722_s20, %s1142_s26 }
 0x24d   : > { %p1140_p3 = pneg %p1139_p4  ;;  %p1145_p7 = scmp.lt.s32.totalorder %s1143_s9, %s1137_s23 }
 0x24f   : > { %p1146_p12 = por %p1145_p7, %p1144_p6 }
 0x251   : > { %p1147_p0 = pnand %p1146_p12, %p1140_p3 }
 0x253   : > { %1150 = shalt.err (!%p1147_p0)
}
 0x254   : > { %s1151_s1 = scalar_lea.hbm %s1727_s30, 512  ;;  %s1155_s12 = scalar_lea.hbm %s1849_s4, 2048 }
 0x255   : > { %p1152_p9 = scmp.ne.s32.totalorder %s1727_s30, %s1151_s1  ;;  %p1156_p11 = scmp.lt.s32.totalorder %s1727_s30, %s1849_s4 }
 0x256   : > { %p1157_p1 = scmp.lt.s32.totalorder %s1155_s12, %s1151_s1 }
 0x257   : > { %p1153_p10 = pnand %p1152_p9, %p1463_p13 }
 0x258   : > { %p1158_p4 = por %p1157_p1, %p1156_p11 }
 0x259   : > { %p1154_p8 = pneg %p1153_p10 }
 0x25b   : > { %p1159_p3 = pnand %p1158_p4, %p1154_p8 }
 0x25d   : > { %1162 = shalt.err (!%p1159_p3)
}
 0x25e   : > { %s1324_s27 = smov 256   ;;  %s1325_s21 = smov 512  }
 0x25f   : > { %s1326_s16 = smov 16   ;;  %s937_s15 = sshll.u32 %s1303_s28, 9 }
 0x260   : > { %942 = dma.vmem_to_hbm [thread:$0]  (%p1463_p13), %s1722_s20, 512, %s1727_s30, %s1731_s14, %s1324_s27, %s1325_s21, %s1326_s16  }
 0x261   : > { %s1894_s26 = sld [smem:[#allocation30_spill]]  ;;  %s735_s17 = sshll.u32 %s1570_s8, 4  ;;  %s1763_s17 = int_to_ptr.vmem [resolvable:$true] %s735_s17 }
 0x262   : > { %s702_s18 = scalar_lea.sflag [#allocation10], %s338_s5  ;;  %s1163_s12 = scalar_lea.vmem %s1763_s17, 512 }
 0x263   : > { %p1164_p6 = scmp.ne.s32.totalorder %s1763_s17, %s1163_s12  ;;  %s1327_s11 = smov [#allocation9]  }
 0x264   : > { %s1167_s28 = sshll.u32 %s1327_s11, 4  ;;  %s1168_s28 = int_to_ptr.vmem [resolvable:$false] %s1167_s28 }
 0x265   : > { %p1165_p7 = pnand %p1164_p6, %p1477_p5  ;;  %s1169_s20 = scalar_lea.vmem %s1168_s28, 1024 }
 0x266   : > { %p1170_p13 = scmp.lt.s32.totalorder %s1763_s17, %s1168_s28  ;;  %p1171_p0 = scmp.lt.s32.totalorder %s1169_s20, %s1163_s12 }
 0x267   : > { %s1895_s9 = smov %s1894_s26  ;;  %s1760_s1 = scalar_lea.hbm %s1894_s26, %s937_s15 }
 0x268   : > { %p1166_p12 = pneg %p1165_p7  ;;  %p1172_p9 = por %p1171_p0, %p1170_p13 }
 0x26a   : > { %p1173_p10 = pnand %p1172_p9, %p1166_p12 }
 0x26c   : > { %1176 = shalt.err (!%p1173_p10)
}
 0x26d   : > { %s1177_s8 = scalar_lea.hbm %s1760_s1, 512  ;;  %s1181_s14 = scalar_lea.hbm %s1895_s9, 1024 }
 0x26e   : > { %p1178_p8 = scmp.ne.s32.totalorder %s1760_s1, %s1177_s8  ;;  %p1182_p4 = scmp.lt.s32.totalorder %s1760_s1, %s1895_s9 }
 0x26f   : > { %p1183_p3 = scmp.lt.s32.totalorder %s1181_s14, %s1177_s8 }
 0x270   : > { %p1179_p11 = pnand %p1178_p8, %p1477_p5 }
 0x271   : > { %p1184_p6 = por %p1183_p3, %p1182_p4 }
 0x272   : > { %p1180_p1 = pneg %p1179_p11 }
 0x274   : > { %p1185_p7 = pnand %p1184_p6, %p1180_p1 }
 0x276   : > { %1188 = shalt.err (!%p1185_p7)
}
 0x277   : > { %943 = dma.vmem_to_hbm [thread:$0]  (%p1477_p5), %s1763_s17, 512, %s1760_s1, %s702_s18, %s1324_s27, %s1324_s27, %s1326_s16  }
 0x278 PF: > { %s1896_s21 = sld [smem:[#allocation17_spill]]  ;;  %p961_p12 = scmp.ge.s32.totalorder %s1315_s6, 2 }
 0x27a   : > { %p954_p13 = pnand %p961_p12, %p1468_p2 }
 0x27c   : > { %p955_p0 = pneg %p954_p13 }
 0x27e   : > { %s750_s23 = sand.u32 1, %s1896_s21  }
 0x27f   : > { %s751_s10 = scalar_lea.sflag [#allocation5], %s750_s23 }
 0x280   : > { %1254 = dma.done.wait (%p955_p0), %s751_s10, 512  }
 0x281   : > { %1256 = vsyncadd (%p955_p0), %s751_s10, 4294966784  ;;  %s1898_s26 = sld [smem:[#allocation15_spill]] }
 0x282   : > { %s1899_s24 = sld [smem:[#allocation28_spill]] }
 0x287   : > { %s759_s12 = sand.u32 1, %s1898_s26  }
 0x288   : > { %p1900_p9 = scmp.ne.s32.totalorder %s1899_s24, 0  ;;  %s760_s11 = scalar_lea.sflag [#allocation10], %s759_s12 }
 0x28a   : > { %p957_p10 = pnand %p961_p12, %p1900_p9 }
 0x28c   : > { %p958_p8 = pneg %p957_p10 }
 0x28e   : > { %1258 = dma.done.wait (%p958_p8), %s760_s11, 512  }
 0x28f   : > { %1260 = vsyncadd (%p958_p8), %s760_s11, 4294966784  ;;  %s28_s6 = sadd.s32 1, %s1315_s6   ;;  %s1902_s16 = sld [smem:[#allocation16_spill]] }
 0x290   : > { %p1798_p5 = scmp.ge.s32.totalorder %s28_s6, 6   ;;  %s1903_s20 = sld [smem:[#allocation26_spill]] }
 0x291   : > { %s1904_s1 = sld [smem:[#allocation18_spill]]  ;;  %s1912_s18 = smov %s1267_s19 }
 0x292   : > { %s1905_s23 = sld [smem:[#allocation24_spill]]  ;;  %s1914_s21 = smov %s1279_s22 }
 0x293   : > { %s1906_s17 = sld [smem:[#allocation19_spill]]  ;;  %s1916_s24 = smov %s1291_s25 }
 0x294   : > { %s1907_s26 = sld [smem:[#allocation23_spill]]  ;;  %s1918_s27 = smov %s1307_s29 }
 0x295   : > { %s1908_s28 = sld [smem:[#allocation20_spill]]  ;;  %s1913_s19 = smov %s1902_s16 }
 0x296   : > { %s1909_s8 = sld [smem:[#allocation21_spill]] }
 0x297   : > { %s1910_s30 = sld [smem:[#allocation22_spill]]  ;;  %s1915_s22 = smov %s1904_s1 }
 0x298   :  { %27 = sbr.rel (!%p1798_p5) target bundleno = 17 (0x11), region = 125 }
 0x299   : > { %s1917_s25 = smov %s1906_s17 }
 0x29c   : > { %s1919_s29 = smov %s1909_s8 }
 0x29d   :  { %765 = vsyncpa [#allocation4], 1 }
 0x29e   :  { %767 = vsyncpa [#allocation4 + $0x1], 1 }
 0x29f   :  { %768 = vsyncpa [#allocation7], 1 }
 0x2a0   :  { %770 = vsyncpa [#allocation7 + $0x1], 1 }
 0x2a1   :  { %771 = vsyncpa [#allocation5], 1 }
 0x2a2   :  { %773 = vsyncpa [#allocation5 + $0x1], 1 }
 0x2a3   :  { %774 = vsyncpa [#allocation10], 1 }
 0x2a4   :  { %776 = vsyncpa [#allocation10 + $0x1], 1 }

</bundles_post_ra>
